<compile_context>
chip_gen: v7x
topology: tpu7x:2x2x1
jax: 0.10.0
libtpu: 0.0.40
codegen_flags: <defaults>
</compile_context>

<pallas_src>
import functools

import jax
import jax.numpy as jnp
from jax.experimental import pallas as pl
from jax.experimental.pallas import tpu as pltpu


def _nonlocal_kernel(x_ref, p_ref, o_ref, *, C):
    # x_ref: (C, HW)   p_ref: (2C+2, IC) f32   o_ref: (C, HW)
    x = x_ref[...].astype(jnp.float32)                       # (C, HW)
    hw = x.shape[-1]

    p = p_ref[...]                                           # (2C+2, IC)
    wt_t = p[0:C, :]                                         # (C, IC)  = Wt^T
    wp_t = p[C:2 * C, :]                                     # (C, IC)  = Wp^T
    bt = p[2 * C:2 * C + 1, :]                               # (1, IC)
    bp = p[2 * C + 1:2 * C + 2, :]                           # (1, IC)

    # x_bar = mean over spatial positions (lane reduction).
    x_bar = jnp.mean(x, axis=-1, keepdims=True)              # (C, 1)

    # theta_bar = mean_i theta_i = Wt @ x_bar + bt, kept as a (1, IC) row.
    theta_bar = jnp.sum(wt_t * x_bar, axis=0, keepdims=True) + bt   # (1, IC)

    # v = Wp^T @ theta_bar  (C, 1);  c0 = bp . theta_bar  (1, 1)
    v = jnp.sum(wp_t * theta_bar, axis=-1, keepdims=True)    # (C, 1)
    c0 = jnp.sum(bp * theta_bar, axis=-1, keepdims=True)     # (1, 1)

    # s_j = theta_bar . phi_j = v . x_j + c0   -> (1, HW)
    s = jnp.sum(v * x, axis=0, keepdims=True) + c0           # (1, HW)

    # torch: confidence = sigmoid(mean_i(f[i, j] / N)),  N = HW
    conf = jax.nn.sigmoid(s * (1.0 / hw))                    # (1, HW)

    o_ref[...] = (conf * x).astype(o_ref.dtype)


@jax.jit
def nonlocal_block_forward(x_nchw, w_theta, b_theta, w_phi, b_phi):
    """x_nchw: (B, C, H, W); w_*: (IC, C, 1, 1) 1x1-conv weights; b_*: (IC,)."""
    B, C, H, W = x_nchw.shape
    HW = H * W
    IC = w_theta.shape[0]

    # Free reshape (no transpose): channels on sublanes, spatial on lanes.
    x_l = x_nchw.reshape(B, C, HW)                           # (B, C, HW)

    # Pack all tiny parameters into one (2C+2, IC) f32 operand.
    wt_t = w_theta.reshape(IC, C).T.astype(jnp.float32)      # (C, IC)
    wp_t = w_phi.reshape(IC, C).T.astype(jnp.float32)        # (C, IC)
    params = jnp.concatenate(
        [wt_t, wp_t,
         b_theta.reshape(1, IC).astype(jnp.float32),
         b_phi.reshape(1, IC).astype(jnp.float32)],
        axis=0)                                              # (2C+2, IC)

    kernel = functools.partial(_nonlocal_kernel, C=C)

    bytes_x = x_l.size * x_l.dtype.itemsize
    cost = pl.CostEstimate(
        flops=int(6 * B * C * HW),            # reductions + broadcast multiplies
        transcendentals=int(B * HW),          # sigmoid
        bytes_accessed=int(2 * bytes_x + params.size * 4),
    )

    out = pl.pallas_call(
        kernel,
        out_shape=jax.ShapeDtypeStruct((B, C, HW), x_nchw.dtype),
        grid_spec=pltpu.PrefetchScalarGridSpec(
            num_scalar_prefetch=0,
            grid=(B,),
            in_specs=[
                pl.BlockSpec((None, C, HW), lambda b: (b, 0, 0)),   # x (batch squeezed)
                pl.BlockSpec((2 * C + 2, IC), lambda b: (0, 0)),    # packed params
            ],
            out_specs=pl.BlockSpec((None, C, HW), lambda b: (b, 0, 0)),
        ),
        compiler_params=pltpu.CompilerParams(
            dimension_semantics=("parallel",),
        ),
        cost_estimate=cost,
    )(x_l, params)

    return out.reshape(B, C, H, W)


def _reference_forward(x, w_theta, b_theta, w_phi, b_phi):
    """Pure-JAX replica of the torch forward (sub_sample=False), for checking."""
    B, C, H, W = x.shape
    IC = w_theta.shape[0]
    xf = x.reshape(B, C, H * W)                                      # (B, C, HW)
    theta = jnp.einsum("ic,bcn->bni", w_theta.reshape(IC, C), xf) + b_theta[None, None, :]
    phi = jnp.einsum("ic,bcn->bin", w_phi.reshape(IC, C), xf) + b_phi[None, :, None]
    f = jnp.einsum("bni,bim->bnm", theta, phi)                       # (B, HW, HW)
    N = f.shape[-1]
    conf = jnp.mean(f / N, axis=1).reshape(B, 1, H, W)
    conf = jax.nn.sigmoid(conf)
    return conf * x


if __name__ == "__main__":
    # Module config: in_channels=4, inter_channels=None -> 2, dimension=2,
    # sub_sample=False (required for the reshape in forward to be valid).
    B, C, H, W = 2, 4, 16, 16
    IC = C // 2

    key = jax.random.PRNGKey(0)
    kx, kwt, kbt, kwp, kbp = jax.random.split(key, 5)

    x = jax.random.normal(kx, (B, C, H, W), dtype=jnp.float32)
    # Deterministic synthetic 1x1-conv parameters (shapes per nn.Conv2d(C, IC, 1)).
    w_theta = jax.random.normal(kwt, (IC, C, 1, 1), dtype=jnp.float32) * 0.1
    b_theta = jax.random.normal(kbt, (IC,), dtype=jnp.float32) * 0.1
    w_phi = jax.random.normal(kwp, (IC, C, 1, 1), dtype=jnp.float32) * 0.1
    b_phi = jax.random.normal(kbp, (IC,), dtype=jnp.float32) * 0.1

    out = nonlocal_block_forward(x, w_theta, b_theta, w_phi, b_phi)
    out = jax.block_until_ready(out)

    ref = _reference_forward(x, w_theta, b_theta, w_phi, b_phi)
    assert out.shape == (B, C, H, W)
    assert jnp.allclose(out, ref, rtol=1e-3, atol=1e-3), "mismatch vs JAX reference"

    print("KERNEL_OK")
</pallas_src>

<mosaic_0001>
module attributes {stable_mosaic.version = 11 : i64} {
  func.func @_nonlocal_kernel(%arg0: i32, %arg1: memref<1x4x256xf32, #tpu.memory_space<vmem>>, %arg2: memref<10x2xf32, #tpu.memory_space<vmem>>, %arg3: memref<1x4x256xf32, #tpu.memory_space<vmem>>) attributes {dimension_semantics = [#tpu.dimension_semantics<parallel>], iteration_bounds = array<i64: 2>, scalar_prefetch = 0 : i64, scratch_operands = 0 : i64, tpu.core_type = #tpu.core_type<tc>, window_params = [{transform_indices = @transform_0, window_bounds = array<i64: 1, 4, 256>}, {pipeline_mode = #tpu.pipeline_mode<synchronous>, transform_indices = @transform_1, window_bounds = array<i64: 10, 2>}, {transform_indices = @transform_2, window_bounds = array<i64: 1, 4, 256>}]} {
    %c0 = arith.constant 0 : index
    %c0_0 = arith.constant 0 : index
    %c0_1 = arith.constant 0 : index
    %0 = vector.load %arg1[%c0, %c0_0, %c0_1] : memref<1x4x256xf32, #tpu.memory_space<vmem>>, vector<1x4x256xf32>
    %1 = vector.shape_cast %0 : vector<1x4x256xf32> to vector<4x256xf32>
    %c0_2 = arith.constant 0 : index
    %c0_3 = arith.constant 0 : index
    %2 = vector.load %arg2[%c0_2, %c0_3] : memref<10x2xf32, #tpu.memory_space<vmem>>, vector<10x2xf32>
    %3 = vector.extract_strided_slice %2 {offsets = [0, 0], sizes = [4, 2], strides = [1, 1]} : vector<10x2xf32> to vector<4x2xf32>
    %4 = vector.extract_strided_slice %2 {offsets = [4, 0], sizes = [4, 2], strides = [1, 1]} : vector<10x2xf32> to vector<4x2xf32>
    %5 = vector.extract_strided_slice %2 {offsets = [8, 0], sizes = [1, 2], strides = [1, 1]} : vector<10x2xf32> to vector<1x2xf32>
    %6 = vector.extract_strided_slice %2 {offsets = [9, 0], sizes = [1, 2], strides = [1, 1]} : vector<10x2xf32> to vector<1x2xf32>
    %cst = arith.constant dense<0.000000e+00> : vector<4xf32>
    %7 = vector.multi_reduction <add>, %1, %cst [1] : vector<4x256xf32> to vector<4xf32>
    %8 = vector.shape_cast %7 : vector<4xf32> to vector<4x1xf32>
    %cst_4 = arith.constant 2.560000e+02 : f32
    %9 = vector.broadcast %cst_4 : f32 to vector<4x1xf32>
    %10 = arith.divf %8, %9 : vector<4x1xf32>
    %11 = vector.broadcast %10 : vector<4x1xf32> to vector<4x2xf32>
    %12 = arith.mulf %3, %11 : vector<4x2xf32>
    %cst_5 = arith.constant dense<0.000000e+00> : vector<2xf32>
    %13 = vector.multi_reduction <add>, %12, %cst_5 [0] : vector<4x2xf32> to vector<2xf32>
    %14 = vector.shape_cast %13 : vector<2xf32> to vector<1x2xf32>
    %15 = arith.addf %14, %5 : vector<1x2xf32>
    %16 = vector.broadcast %15 : vector<1x2xf32> to vector<4x2xf32>
    %17 = arith.mulf %4, %16 : vector<4x2xf32>
    %cst_6 = arith.constant dense<0.000000e+00> : vector<4xf32>
    %18 = vector.multi_reduction <add>, %17, %cst_6 [1] : vector<4x2xf32> to vector<4xf32>
    %19 = vector.shape_cast %18 : vector<4xf32> to vector<4x1xf32>
    %20 = arith.mulf %6, %15 : vector<1x2xf32>
    %cst_7 = arith.constant dense<0.000000e+00> : vector<1xf32>
    %21 = vector.multi_reduction <add>, %20, %cst_7 [1] : vector<1x2xf32> to vector<1xf32>
    %22 = vector.shape_cast %21 : vector<1xf32> to vector<1x1xf32>
    %23 = vector.broadcast %19 : vector<4x1xf32> to vector<4x256xf32>
    %24 = arith.mulf %23, %1 : vector<4x256xf32>
    %cst_8 = arith.constant dense<0.000000e+00> : vector<256xf32>
    %25 = vector.multi_reduction <add>, %24, %cst_8 [0] : vector<4x256xf32> to vector<256xf32>
    %26 = vector.shape_cast %25 : vector<256xf32> to vector<1x256xf32>
    %27 = vector.broadcast %22 : vector<1x1xf32> to vector<1x256xf32>
    %28 = arith.addf %26, %27 : vector<1x256xf32>
    %cst_9 = arith.constant 3.906250e-03 : f32
    %29 = vector.broadcast %cst_9 : f32 to vector<1x256xf32>
    %30 = arith.mulf %28, %29 : vector<1x256xf32>
    %31 = arith.negf %30 : vector<1x256xf32>
    %32 = math.exp %31 : vector<1x256xf32>
    %cst_10 = arith.constant 1.000000e+00 : f32
    %33 = vector.broadcast %cst_10 : f32 to vector<1x256xf32>
    %34 = arith.addf %33, %32 : vector<1x256xf32>
    %35 = arith.divf %33, %34 : vector<1x256xf32>
    %36 = vector.broadcast %35 : vector<1x256xf32> to vector<4x256xf32>
    %37 = arith.mulf %36, %1 : vector<4x256xf32>
    %c0_11 = arith.constant 0 : index
    %c0_12 = arith.constant 0 : index
    %c0_13 = arith.constant 0 : index
    %38 = vector.load %arg3[%c0_11, %c0_12, %c0_13] : memref<1x4x256xf32, #tpu.memory_space<vmem>>, vector<1x4x256xf32>
    %39 = vector.shape_cast %38 : vector<1x4x256xf32> to vector<4x256xf32>
    %40 = vector.shape_cast %37 : vector<4x256xf32> to vector<1x4x256xf32>
    tpu.vector_store %arg3[%c0_11, %c0_12, %c0_13], %40 {strides = array<i32>} : memref<1x4x256xf32, #tpu.memory_space<vmem>>, vector<1x4x256xf32>,
    return
  }
  func.func @transform_0(%arg0: i32) -> (i32, i32, i32) {
    %c0_i32 = arith.constant 0 : i32
    %c0_i32_0 = arith.constant 0 : i32
    %c0_i32_1 = arith.constant 0 : i32
    return %arg0, %c0_i32, %c0_i32_0 : i32, i32, i32
  }
  func.func @transform_1(%arg0: i32) -> (i32, i32) {
    %c0_i32 = arith.constant 0 : i32
    %c0_i32_0 = arith.constant 0 : i32
    %c0_i32_1 = arith.constant 0 : i32
    return %c0_i32, %c0_i32_0 : i32, i32
  }
  func.func @transform_2(%arg0: i32) -> (i32, i32, i32) {
    %c0_i32 = arith.constant 0 : i32
    %c0_i32_0 = arith.constant 0 : i32
    %c0_i32_1 = arith.constant 0 : i32
    return %arg0, %c0_i32, %c0_i32_0 : i32, i32, i32
  }
}

</mosaic_0001>

<bundles_post_ra>
// kernel: nonlocal_block_forward.1
= control target key start
LH: loop header
LB: loop body
LE: loop exit
PB: predicated region body
PF: predicated region fallthrough
CT: control target
= control target key end

     0   :  { %s351_s9 = smov 0   ;;  %s398_s0 = inlined_call_operand.vmem [shape: f32[2,4,256], index: 0, kind: input, shape index: {}]   ;;  %s399_s1 = inlined_call_operand.vmem [shape: f32[10,2], index: 1, kind: input, shape index: {}]   ;;  %s400_s2 = inlined_call_operand.vmem [shape: f32[2,4,256], index: 2, kind: output, shape index: {}]  }
   0x1 LB: > { %s295_s10 = sadd.s32 4294967295, %s334_s9   ;;  %p299_p0 = scmp.ge.s32.totalorder %s334_s9, 1  ;;  %s334_s9 = sphi %s351_s9, %s12_s9  }
   0x2   : > { %p112_p1 = scmp.lt.s32.totalorder %s334_s9, 3 }
   0x4   : > { %p113_p2 = pnand %p299_p0, %p112_p1 }
   0x5   : > { %p134_p3 = scmp.lt.s32.totalorder (!%p113_p2), %s295_s10, 1  ;;  %vm150_vm0 = vcmask (!%p113_p2), 1043456   ;;  %v145_v5 = vld [vmem:[%s399_s1] sm:$0xff] (!%p113_p2)  ;;  %vm159_vm1 = vcmask (!%p113_p2), 11264   ;;  %v168_v12 = vlaneseq (!%p113_p2)  ;;  %v146_v17 = vld [vmem:[%s399_s1 + $0x8] sm:$0x3] (!%p113_p2) }
   0x6   : > { %116 = sbr.rel (%p113_p2) target bundleno = 385 (0x181), region = 28  ;;  %vm181_vm2 = vcmask (!%p113_p2), 9217   ;;  %vm173_vm3 = vcmask (!%p113_p2), 15364  }
   0x7   : > { %v169_v15 = vshrl.u32 (!%p113_p2), %v168_v12, 7 }
   0x9   : > { %v170_v19 = vsub.s32 (!%p113_p2), 0, %v169_v15  ;;  %v227_v58 = vsub.s32 (!%p113_p2), 1, %v169_v15 }
   0xd   : > { %s402_s10 = smov (!%p134_p3, %s295_s10), 1 }
   0xe   : > { %s308_s11 = sshll.u32 %s402_s10, 3 }
   0xf   : > { %s138_s14 = scalar_lea.vmem %s398_s0, %s308_s11  ;;  %s143_s21 = scalar_lea.vmem %s400_s2, %s308_s11 }
  0x10   : > { %v367_v0 = vld [vmem:[%s138_s14] sm:$0xff] }
  0x11   : > { %v371_v1 = vcombine.high %v367_v0, %v367_v0  ;;  %v151_v2 = vsel %vm150_vm0, %v367_v0, 0.0  ;;  %v185_v27 = vcombine.low %v367_v0, %v367_v0 }
  0x13   : > { %v152_v3 = vsel %vm150_vm0, %v371_v1, 0.0 }
  0x14   : > { %v153_v4 = vadd.f32 %v152_v3, %v151_v2 }
  0x16   : > { %154 = vadd.xlane.f32.xlu0 %v153_v4 }
  0xa3   : > { %v155_v6 = vpop.xlane.xlu0 %154 }
  0xa4   : > { %v157_v7 = vmul.f32 0.00390625, %v155_v6 }
  0xa6   : > { %v158_v8 = vmul.f32 %v157_v7, %v145_v5 }
  0xa8   : > { %v160_v9 = vsel %vm159_vm1, %v158_v8, 0.0 }
  0xa9   : > { %v161_v10 = vrot.slane %v160_v9, 4 }
  0xab   : > { %v162_v11 = vadd.f32 %v161_v10, %v160_v9 }
  0xad   : > { %v163_v13 = vrot.slane %v162_v11, 2 }
  0xaf   : > { %v164_v14 = vadd.f32 %v163_v13, %v162_v11 }
  0xb1   : > { %v165_v16 = vrot.slane %v164_v14, 1 }
  0xb3   : > { %v166_v18 = vadd.f32 %v165_v16, %v164_v14 }
  0xb5   : > { %v167_v20 = vadd.f32 %v166_v18, %v146_v17 }
  0xb7   : > { %v178_v21 = vrot.slane %v167_v20, 7  ;;  %v171_v22 = vrot.slane %v167_v20, %v170_v19 }
  0xb9   : > { %v180_v23 = vmul.f32 %v178_v21, %v146_v17  ;;  %v172_v24 = vmul.f32 %v171_v22, %v145_v5 }
  0xbb   : > { %v182_v25 = vsel %vm181_vm2, %v180_v23, 0.0  ;;  %v174_v26 = vsel %vm173_vm3, %v172_v24, 0.0 }
  0xbc   : > { %183 = vadd.xlane.f32.xlu1 %v182_v25  ;;  %175 = vadd.xlane.f32.xlu0 %v174_v26 }
 0x149   : > { %v176_v28 = vpop.xlane.xlu0 %175  ;;  %v184_v47 = vpop.xlane.xlu1 %183 }
 0x14a   : > { %v187_v29 = vmul.f32 %v185_v27, %v176_v28  ;;  %v188_v30 = vmul.f32 %v176_v28, %v367_v0 }
 0x14c   : > { %v191_v31 = vrot.slane %v187_v29, 4  ;;  %v192_v32 = vrot.slane %v188_v30, 4 }
 0x14e   : > { %v195_v33 = vsel %vm150_vm0, %v191_v31, 0.0  ;;  %v202_v34 = vsel %vm150_vm0, %v192_v32, 0.0 }
 0x14f   : > { %v196_v35 = vrot.slane %v195_v33, 4  ;;  %v203_v36 = vrot.slane %v202_v34, 4 }
 0x151   : > { %v197_v37 = vadd.f32 %v196_v35, %v195_v33  ;;  %v204_v38 = vadd.f32 %v203_v36, %v202_v34 }
 0x153   : > { %v198_v39 = vrot.slane %v197_v37, 2  ;;  %v205_v40 = vrot.slane %v204_v38, 2 }
 0x155   : > { %v199_v41 = vadd.f32 %v198_v39, %v197_v37  ;;  %v206_v42 = vadd.f32 %v205_v40, %v204_v38 }
 0x157   : > { %v200_v43 = vrot.slane %v199_v41, 1  ;;  %v207_v44 = vrot.slane %v206_v42, 1 }
 0x159   : > { %v201_v45 = vadd.f32 %v200_v43, %v199_v41  ;;  %v208_v46 = vadd.f32 %v207_v44, %v206_v42 }
 0x15b   : > { %v209_v48 = vadd.f32 %v201_v45, %v184_v47  ;;  %v210_v49 = vadd.f32 %v208_v46, %v184_v47 }
 0x15d   : > { %v304_v50 = vmul.f32 -0.00390625, %v209_v48  ;;  %v305_v51 = vmul.f32 -0.00390625, %v210_v49 }
 0x15f   : > { %v215_v52 = vmul.f32 1.442695, %v304_v50  ;;  %v217_v53 = vmul.f32 1.442695, %v305_v51 }
 0x161   : > { %320 = vpow2.f32 %v215_v52 }
 0x162   : > { %322 = vpow2.f32 %v217_v53 }
 0x16b   : > { %v321_v54 = vpop.eup %320 }
 0x16c   : > { %v323_v55 = vpop.eup %322  ;;  %v219_v56 = vadd.f32 1.0, %v321_v54 }
 0x16d   : > { %v220_v57 = vadd.f32 1.0, %v323_v55 }
 0x16e   : > { %324 = vrcp.f32 %v219_v56 }
 0x16f   : > { %326 = vrcp.f32 %v220_v57 }
 0x178   : > { %v325_v59 = vpop.eup %324 }
 0x179   : > { %v327_v60 = vpop.eup %326  ;;  %v228_v61 = vrot.slane %v325_v59, %v227_v58 }
 0x17a   : > { %v232_v62 = vrot.slane %v327_v60, %v227_v58 }
 0x17b   : > { %v233_v63 = vmul.f32 %v228_v61, %v367_v0 }
 0x17c   : > { %v234_v2 = vmul.f32 %v232_v62, %v371_v1 }
 0x17e   : > { %v237_v3 = vcombine.low %v233_v63, %v234_v2 }
 0x180   : > { %239 = vst [vmem:[%s143_s21] sm:$0xff] %v237_v3 }
 0x181 PF: > { %s12_s9 = sadd.s32 1, %s334_s9  }
 0x182   : > { %p9_p4 = scmp.ge.s32.totalorder %s12_s9, 4  }
 0x184   :  { %11 = sbr.rel (!%p9_p4) target bundleno = 1 (0x1), region = 58 }

</bundles_post_ra>
